<compile_context>
chip_gen: v7x
topology: tpu7x:2x2x1
jax: 0.10.0
libtpu: 0.0.40
codegen_flags: <defaults>
</compile_context>

<pallas_src>
import functools

import jax
import jax.numpy as jnp
from jax.experimental import pallas as pl
from jax.experimental.pallas import tpu as pltpu


def _round_up(x, m):
    return (x + m - 1) // m * m


def _time_mlp_eval_kernel(x_ref, w_ref, b_ref, o_ref):
    # x_ref: (TM, K)   w_ref: (K, Np)   b_ref: (1, Np)   o_ref: (TM, Np)
    y = jnp.dot(x_ref[...], w_ref[...], preferred_element_type=jnp.float32)
    y = jnp.maximum(y + b_ref[...], 0.0)                     # bias + ReLU
    o_ref[...] = y.astype(o_ref.dtype)


def _time_mlp_train_kernel(x_ref, w_ref, b_ref, u_ref, o_ref, *, dropout_prob):
    # Same as eval, plus inverted dropout driven by externally supplied
    # uniform randoms u_ref in [0, 1).
    y = jnp.dot(x_ref[...], w_ref[...], preferred_element_type=jnp.float32)
    y = jnp.maximum(y + b_ref[...], 0.0)
    keep = u_ref[...] >= jnp.float32(dropout_prob)           # P(keep) = 1 - p
    scale = jnp.float32(1.0 / (1.0 - dropout_prob))
    o_ref[...] = jnp.where(keep, y * scale, jnp.float32(0.0)).astype(o_ref.dtype)


def time_mlp(x, weight, bias, *, dropout_prob=0.1, training=False,
             rng_key=None, block_m=512, compute_dtype=None):
    """TimeMLP forward: Dropout(ReLU(x @ weight.T + bias)).

    x:      (B, C, input_size)
    weight: (output_size, input_size)    (PyTorch nn.Linear layout)
    bias:   (output_size,)
    returns (B, C, output_size)
    """
    B, C, K = x.shape
    N = weight.shape[0]
    M = B * C

    # ---- wrapper-side layout plumbing (one-time, outside the kernel) ------
    x2 = x.reshape(M, K)
    w_kn = weight.T                                  # (K, N): no in-kernel .T
    Np = _round_up(N, 128)                           # lane-dense output slab
    if Np != N:
        w_kn = jnp.pad(w_kn, ((0, 0), (0, Np - N)))
        b2 = jnp.pad(bias.reshape(1, N), ((0, 0), (0, Np - N)))
    else:
        b2 = bias.reshape(1, N)

    if compute_dtype is not None:                    # e.g. jnp.bfloat16 on v6e/v7x
        x2 = x2.astype(compute_dtype)
        w_kn = w_kn.astype(compute_dtype)

    # ---- tiling of the M = B*C axis ----------------------------------------
    tm = M if M <= block_m else block_m              # block_m is a multiple of 8
    grid = (pl.cdiv(M, tm),)

    x_spec = pl.BlockSpec((tm, K), lambda i: (i, 0))
    w_spec = pl.BlockSpec((K, Np), lambda i: (0, 0))     # VMEM-resident
    b_spec = pl.BlockSpec((1, Np), lambda i: (0, 0))     # VMEM-resident
    o_spec = pl.BlockSpec((tm, Np), lambda i: (i, 0))

    use_dropout = training and dropout_prob > 0.0
    if use_dropout:
        if not (0.0 <= dropout_prob < 1.0):
            raise ValueError("dropout_prob must be in [0, 1) in training mode")
        if rng_key is None:
            rng_key = jax.random.PRNGKey(0)
        # Each grid step reads its own (tm, Np) slice -> independent masks.
        # TODO(synk): switch to on-chip pltpu.prng_* with a program_id-mixed
        # seed on real TPU runtimes to avoid streaming the mask from HBM.
        u = jax.random.uniform(rng_key, (M, Np), dtype=jnp.float32)
        kernel = functools.partial(_time_mlp_train_kernel,
                                   dropout_prob=float(dropout_prob))
        in_specs = [x_spec, w_spec, b_spec,
                    pl.BlockSpec((tm, Np), lambda i: (i, 0))]
        args = (x2, w_kn, b2, u)
    else:
        kernel = _time_mlp_eval_kernel
        in_specs = [x_spec, w_spec, b_spec]
        args = (x2, w_kn, b2)

    out = pl.pallas_call(
        kernel,
        out_shape=jax.ShapeDtypeStruct((M, Np), x.dtype),
        grid_spec=pltpu.PrefetchScalarGridSpec(
            num_scalar_prefetch=0,
            grid=grid,
            in_specs=in_specs,
            out_specs=o_spec,
        ),
        compiler_params=pltpu.CompilerParams(
            dimension_semantics=("parallel",)),      # v7x: shard M over both TCs
    )(*args)

    return out[:, :N].reshape(B, C, N)


if __name__ == "__main__":
    # Module config (hidden_size is unused by TimeMLP.forward).
    batch, channels = 2, 4
    input_size, hidden_size, output_size = 16, 32, 16
    dropout_prob = 0.1

    key = jax.random.PRNGKey(0)
    kx, kw, kb, kd = jax.random.split(key, 4)

    x = jax.random.normal(kx, (batch, channels, input_size), dtype=jnp.float32)
    # nn.Linear-style init: weight (out, in), bias (out,)
    bound = 1.0 / (input_size ** 0.5)
    weight = jax.random.uniform(kw, (output_size, input_size),
                                minval=-bound, maxval=bound, dtype=jnp.float32)
    bias = jax.random.uniform(kb, (output_size,),
                              minval=-bound, maxval=bound, dtype=jnp.float32)

    # ---- eval mode (dropout = identity): compare against plain-JAX reference
    y_eval = time_mlp(x, weight, bias, dropout_prob=dropout_prob,
                      training=False)
    jax.block_until_ready(y_eval)
    y_ref = jnp.maximum(jnp.einsum("bck,nk->bcn", x, weight) + bias, 0.0)
    assert y_eval.shape == (batch, channels, output_size)
    assert jnp.allclose(y_eval, y_ref, atol=1e-5, rtol=1e-5)

    # ---- train mode (dropout active, deterministic given rng_key) ----------
    y_train = time_mlp(x, weight, bias, dropout_prob=dropout_prob,
                       training=True, rng_key=kd)
    jax.block_until_ready(y_train)
    assert y_train.shape == (batch, channels, output_size)
    # Every train-mode element is either dropped (0) or the eval value scaled
    # by 1/(1-p) -- inverted-dropout semantics.
    scaled = y_ref / (1.0 - dropout_prob)
    ok = jnp.isclose(y_train, 0.0, atol=1e-6) | jnp.isclose(
        y_train, scaled, atol=1e-5, rtol=1e-5)
    assert bool(jnp.all(ok))

    print("KERNEL_OK")
</pallas_src>

<mosaic_0001>
module attributes {stable_mosaic.version = 11 : i64} {
  func.func @_time_mlp_eval_kernel(%arg0: i32, %arg1: memref<8x16xf32, #tpu.memory_space<vmem>>, %arg2: memref<16x128xf32, #tpu.memory_space<vmem>>, %arg3: memref<1x128xf32, #tpu.memory_space<vmem>>, %arg4: memref<8x128xf32, #tpu.memory_space<vmem>>) attributes {dimension_semantics = [#tpu.dimension_semantics<parallel>], iteration_bounds = array<i64: 1>, scalar_prefetch = 0 : i64, scratch_operands = 0 : i64, tpu.core_type = #tpu.core_type<tc>, window_params = [{transform_indices = @transform_0, window_bounds = array<i64: 8, 16>}, {pipeline_mode = #tpu.pipeline_mode<synchronous>, transform_indices = @transform_1, window_bounds = array<i64: 16, 128>}, {pipeline_mode = #tpu.pipeline_mode<synchronous>, transform_indices = @transform_2, window_bounds = array<i64: 1, 128>}, {transform_indices = @transform_3, window_bounds = array<i64: 8, 128>}]} {
    %c0 = arith.constant 0 : index
    %c0_0 = arith.constant 0 : index
    %0 = vector.load %arg1[%c0, %c0_0] : memref<8x16xf32, #tpu.memory_space<vmem>>, vector<8x16xf32>
    %c0_1 = arith.constant 0 : index
    %c0_2 = arith.constant 0 : index
    %1 = vector.load %arg2[%c0_1, %c0_2] : memref<16x128xf32, #tpu.memory_space<vmem>>, vector<16x128xf32>
    %cst = arith.constant dense<0.000000e+00> : vector<8x128xf32>
    %2 = tpu.matmul %0, %1, %cst {dimension_numbers = #tpu.dot_dimension_numbers<[1], [0], [0], [1], [0, 0, 1, 1], [], []>} : vector<8x16xf32>, vector<16x128xf32>, vector<8x128xf32> -> vector<8x128xf32>
    %c0_3 = arith.constant 0 : index
    %c0_4 = arith.constant 0 : index
    %3 = vector.load %arg3[%c0_3, %c0_4] : memref<1x128xf32, #tpu.memory_space<vmem>>, vector<1x128xf32>
    %4 = vector.broadcast %3 : vector<1x128xf32> to vector<8x128xf32>
    %5 = arith.addf %2, %4 : vector<8x128xf32>
    %cst_5 = arith.constant 0.000000e+00 : f32
    %6 = vector.broadcast %cst_5 : f32 to vector<8x128xf32>
    %7 = arith.maximumf %5, %6 : vector<8x128xf32>
    %c0_6 = arith.constant 0 : index
    %c0_7 = arith.constant 0 : index
    %8 = vector.load %arg4[%c0_6, %c0_7] : memref<8x128xf32, #tpu.memory_space<vmem>>, vector<8x128xf32>
    tpu.vector_store %arg4[%c0_6, %c0_7], %7 {strides = array<i32>} : memref<8x128xf32, #tpu.memory_space<vmem>>, vector<8x128xf32>,
    return
  }
  func.func @transform_0(%arg0: i32) -> (i32, i32) {
    %c0_i32 = arith.constant 0 : i32
    %c0_i32_0 = arith.constant 0 : i32
    return %arg0, %c0_i32 : i32, i32
  }
  func.func @transform_1(%arg0: i32) -> (i32, i32) {
    %c0_i32 = arith.constant 0 : i32
    %c0_i32_0 = arith.constant 0 : i32
    %c0_i32_1 = arith.constant 0 : i32
    return %c0_i32, %c0_i32_0 : i32, i32
  }
  func.func @transform_2(%arg0: i32) -> (i32, i32) {
    %c0_i32 = arith.constant 0 : i32
    %c0_i32_0 = arith.constant 0 : i32
    %c0_i32_1 = arith.constant 0 : i32
    return %c0_i32, %c0_i32_0 : i32, i32
  }
  func.func @transform_3(%arg0: i32) -> (i32, i32) {
    %c0_i32 = arith.constant 0 : i32
    %c0_i32_0 = arith.constant 0 : i32
    return %arg0, %c0_i32 : i32, i32
  }
}

</mosaic_0001>

<bundles_post_ra>
// kernel: tpu_custom_call.1
= control target key start
LH: loop header
LB: loop body
LE: loop exit
PB: predicated region body
PF: predicated region fallthrough
CT: control target
= control target key end

     0   :  { %8 = vsyncpa [#allocation3], 0  ;;  %s312_s0 = inlined_call_operand.hbm [shape: f32[8,16], index: 0, kind: input, shape index: {}]   ;;  %s313_s1 = inlined_call_operand.hbm [shape: f32[16,128], index: 1, kind: input, shape index: {}]   ;;  %s314_s2 = inlined_call_operand.vmem [shape: f32[1,128], index: 2, kind: input, shape index: {}]   ;;  %s315_s3 = inlined_call_operand.hbm [shape: f32[8,128], index: 3, kind: output, shape index: {}]  }
   0x1   :  { %9 = vsyncpa [#allocation6], 0 }
   0x2   :  { %10 = vsyncpa [#allocation4], 0  ;;  %s238_s12 = smov [#allocation2]   ;;  %s239_s14 = smov [#allocation5]  }
   0x3   :  { %s17_s13 = sshll.u32 %s238_s12, 4  ;;  %s26_s15 = sshll.u32 %s239_s14, 4  ;;  %s18_s13 = int_to_ptr.vmem [resolvable:$true] %s17_s13  ;;  %s266_s15 = int_to_ptr.vmem [resolvable:$true] %s26_s15 }
   0x4   :  { %s166_s18 = scalar_lea.hbm %s312_s0, 128 }
   0x5   :  { %p167_p0 = scmp.ne.s32.totalorder %s312_s0, %s166_s18  ;;  %p170_p1 = scmp.lt.u32.totalorder %s166_s18, %s312_s0 }
   0x7   :  { %p172_p2 = pnand %p170_p1, %p167_p0 }
   0x9   :  { %175 = shalt.err (!%p172_p2)
}
   0xa   :  { %s176_s23 = scalar_lea.vmem %s18_s13, 128  ;;  %p181_p4 = scmp.lt.s32.totalorder %s18_s13, %s18_s13 }
   0xb   :  { %p177_p3 = scmp.ne.s32.totalorder %s18_s13, %s176_s23  ;;  %p182_p5 = scmp.lt.s32.totalorder %s176_s23, %s176_s23 }
   0xd   :  { %p183_p6 = por %p182_p5, %p181_p4 }
   0xf   :  { %p184_p7 = pnand %p183_p6, %p177_p3 }
  0x11   :  { %187 = shalt.err (!%p184_p7)
}
  0x12   :  { %20 = dma.hbm_to_vmem [thread:$0]  %s312_s0, 128, %s18_s13, [#allocation3]  }
  0x13   :  { %s188_s28 = scalar_lea.hbm %s313_s1, 256 }
  0x14   :  { %p189_p8 = scmp.ne.s32.totalorder %s313_s1, %s188_s28  ;;  %p192_p9 = scmp.lt.u32.totalorder %s188_s28, %s313_s1 }
  0x16   :  { %p194_p10 = pnand %p192_p9, %p189_p8 }
  0x18   :  { %197 = shalt.err (!%p194_p10)
}
  0x19   :  { %s198_s6 = scalar_lea.vmem %s266_s15, 256  ;;  %p203_p12 = scmp.lt.s32.totalorder %s266_s15, %s266_s15 }
  0x1a   :  { %p199_p11 = scmp.ne.s32.totalorder %s266_s15, %s198_s6  ;;  %p204_p13 = scmp.lt.s32.totalorder %s198_s6, %s198_s6 }
  0x1c   :  { %p205_p0 = por %p204_p13, %p203_p12 }
  0x1e   :  { %p206_p1 = pnand %p205_p0, %p199_p11 }
  0x20   :  { %209 = shalt.err (!%p206_p1)
}
  0x21   :  { %s240_s0 = smov 128   ;;  %s241_s7 = smov 8  }
  0x22   :  { %32 = dma.hbm_to_vmem [thread:$0]  %s313_s1, 256, %s266_s15, [#allocation6], %s240_s0, %s240_s0, %s241_s7  }
  0x23   :  { %232 = dma.done.wait [#allocation3], 128  }
  0x24   :  { %233 = vsyncadd [#allocation3], 4294967168 }
  0x25   :  { %234 = dma.done.wait [#allocation6], 256  }
  0x26   :  { %235 = vsyncadd [#allocation6], 4294967040  ;;  %v242_v0 = vmov 0.0|0.0   ;;  %vm243_vm0 = vmmov 0   ;;  %v244_v1 = vmov 0.0   ;;  %v42_v2 = vld [vmem:[#allocation5] sm:$0xff] }
  0x27   :  { %155 = vmatprep.subr.bf16.mxu0 %v242_v0  ;;  %152 = vmatprep.mubr.msk.f32.mxu0 %vm243_vm0, %v244_v1  ;;  %v43_v3 = vld [vmem:[#allocation5 + $0x8] sm:$0xff]  ;;  %v41_v5 = vld [vmem:[#allocation2] sm:$0xff]  ;;  %vm51_vm1 = vcmask 130048   ;;  %s245_s1 = smov [#allocation7]  }
  0x28   :  { %v156_v4 = vpack.c.bf16 %v43_v3, %v42_v2  ;;  %v143_v6 = vld [vmem:[%s314_s2] ss:$0 sm:$0xff]  ;;  %s133_s12 = sshll.u32 %s245_s1, 4  ;;  %s134_s12 = int_to_ptr.vmem [resolvable:$true] %s133_s12 }
  0x29   :  { %s210_s13 = scalar_lea.vmem %s134_s12, 128  ;;  %p215_p3 = scmp.lt.s32.totalorder %s134_s12, %s134_s12 }
  0x2a   :  { %157 = vmatpush3.bf16.msra.mxu0 %v156_v4  ;;  %p211_p2 = scmp.ne.s32.totalorder %s134_s12, %s210_s13  ;;  %p216_p4 = scmp.lt.s32.totalorder %s210_s13, %s210_s13 }
  0x2c   :  { %p217_p5 = por %p216_p4, %p215_p3 }
  0x2d   :  { %153 = vmatmul.mubr.msk.f32.vlgmr.msra.gmra.mrb[0].mxu0 %vm51_vm1, %v41_v5 }
  0x2e   :  { %p218_p6 = pnand %p217_p5, %p211_p2 }
 0x100   :  { %v121_v7 = vpop.f32.mrb[0].mxu0 }
 0x101   :  { %v122_v8 = vadd.f32 %v143_v6, %v121_v7  ;;  %v154_v9 = vpop.f32.mrb[1].mxu0 }
 0x103   :  { %v125_v10 = vmax.f32 %v122_v8, 0.0 }
 0x105   :  { %126 = vst [vmem:[#allocation7] sm:$0xff] %v125_v10 }
 0x106   :  { %221 = shalt.err (!%p218_p6)
}
 0x107   :  { %s222_s16 = scalar_lea.hbm %s315_s3, 128 }
 0x108   :  { %p223_p7 = scmp.ne.s32.totalorder %s315_s3, %s222_s16  ;;  %p226_p8 = scmp.lt.u32.totalorder %s222_s16, %s315_s3 }
 0x10a   :  { %p228_p9 = pnand %p226_p8, %p223_p7 }
 0x10c   :  { %231 = shalt.err (!%p228_p9)
}
 0x10d   :  { %136 = dma.vmem_to_hbm [thread:$0]  %s134_s12, 128, %s315_s3, [#allocation4]  }
 0x10e   :  { %236 = dma.done.wait [#allocation4], 128  }
 0x10f   :  { %237 = vsyncadd [#allocation4], 4294967168 }
 0x110   :  { %140 = vsyncpa [#allocation3], 1 }
 0x111   :  { %141 = vsyncpa [#allocation6], 1 }
 0x112   :  { %142 = vsyncpa [#allocation4], 1 }

</bundles_post_ra>
